<compile_context>
chip_gen: v7x
topology: tpu7x:2x2x1
jax: 0.10.0
libtpu: 0.0.40
codegen_flags: <defaults>
</compile_context>

<pallas_src>
import functools
import math

import jax
import jax.numpy as jnp
from jax.experimental import pallas as pl
from jax.experimental.pallas import tpu as pltpu


_MIN_GRID_STEPS = 4                 # megacore sharding + pipeline overlap
_VMEM_BUDGET_BYTES = 12 * 1024 * 1024   # conservative: v5e scoped default is 16 MiB


def _cdiv(a, b):
    return -(-a // b)


def _round_up(a, m):
    return _cdiv(a, m) * m


def _choose_spatial_tile(n, hw, c_in, c_out, in_itemsize, ts_max):
    """Lane tile for the H*W axis: a multiple of 128 (or the full extent)."""
    if hw < 128:
        # Only the full extent is a sensible (and legal) lane block here.
        return hw
    # Double-buffered per-lane footprint: input tile + both f32-or-narrower
    # output tiles (outputs use the input dtype).
    per_lane = 2 * (c_in * in_itemsize + 2 * c_out * in_itemsize)
    ts_vmem = max(128, (_VMEM_BUDGET_BYTES // per_lane) // 128 * 128)
    cap = min(ts_max, ts_vmem, (hw // 128) * 128)
    if n * _cdiv(hw, cap) >= _MIN_GRID_STEPS:
        return cap
    # Too few grid steps: shrink the tile so both v7x TensorCores get work
    # and DMA of step i+1 overlaps compute of step i.
    want_blocks = _cdiv(_MIN_GRID_STEPS, n)
    ts = _round_up(_cdiv(hw, want_blocks), 128)
    return max(128, min(ts, cap))


def _dgauss_kernel(x_ref, w_ref, b_ref, loc_ref, ls_ref):
    """One grid step: (C_in, ts) activation tile -> fused (2*C_out, ts) result."""
    x = x_ref[0]                                                  # (C_in, ts), lane-dense
    y = jnp.dot(w_ref[...], x,
                preferred_element_type=jnp.float32) + b_ref[...]  # (2*C_out, ts) f32
    c_out = loc_ref.shape[1]
    loc_ref[0] = y[:c_out].astype(loc_ref.dtype)
    ls_ref[0] = y[c_out:].astype(ls_ref.dtype)


@functools.partial(jax.jit, static_argnames=("ts_max",))
def dgauss_forward(h_nchw, w_loc, b_loc, w_ls, b_ls, log_t, *, ts_max=32768):
    """DGaussNet.forward.

    h_nchw : (N, C_in, H, W) float32 or bfloat16   (PyTorch NCHW input)
    w_loc  : (C_out, C_in)  x_loc 1x1-conv weight (PyTorch layout, squeezed)
    b_loc  : (C_out, 1)
    w_ls   : (C_out, C_in)  x_logscale 1x1-conv weight
    b_ls   : (C_out, 1)
    log_t  : (1, 1) float32  -- log(t) if t is given, else 0.0

    Returns (loc, logscale), both (N, C_out, H, W), in h's dtype.
    """
    N, C_in, H, W = h_nchw.shape
    C_out = w_loc.shape[0]
    HW = H * W

    # Free reshape: NCHW is already (N, C_in, H*W) contiguous -- no transpose,
    # no extra HBM traffic.
    x = h_nchw.reshape(N, C_in, HW)
    out_dtype = x.dtype

    # Fuse both heads into one weight/bias; fold log(t) into the logscale bias
    # so the kernel has no scalar operand and no per-tile broadcast add.
    # The weight matches the activation dtype (bf16 in -> single-pass bf16 MXU
    # with f32 accumulation; f32 in -> f32, MXU is nowhere near the bottleneck).
    w_fused = jnp.concatenate([w_loc, w_ls], axis=0).astype(x.dtype)       # (2*C_out, C_in)
    b_fused = jnp.concatenate([b_loc, b_ls + log_t], axis=0).astype(jnp.float32)  # (2*C_out, 1)

    # Spatial (lane) tile: as large as the VMEM budget allows (amortizes the
    # ~0.35 us per-grid-step overhead), a multiple of 128, but split enough to
    # keep >= _MIN_GRID_STEPS total steps.  Ragged last block is masked by
    # Pallas (no jnp.pad copy).
    ts = _choose_spatial_tile(N, HW, C_in, C_out, x.dtype.itemsize, ts_max)
    grid = (N, _cdiv(HW, ts))

    loc3, ls3 = pl.pallas_call(
        _dgauss_kernel,
        out_shape=(
            jax.ShapeDtypeStruct((N, C_out, HW), out_dtype),
            jax.ShapeDtypeStruct((N, C_out, HW), out_dtype),
        ),
        grid_spec=pltpu.PrefetchScalarGridSpec(
            num_scalar_prefetch=0,
            grid=grid,
            in_specs=[
                pl.BlockSpec((1, C_in, ts), lambda n, s: (n, 0, s)),   # activations
                pl.BlockSpec((2 * C_out, C_in), lambda n, s: (0, 0)),  # fused weight (resident)
                pl.BlockSpec((2 * C_out, 1), lambda n, s: (0, 0)),     # fused bias (resident)
            ],
            out_specs=[
                pl.BlockSpec((1, C_out, ts), lambda n, s: (n, 0, s)),  # loc
                pl.BlockSpec((1, C_out, ts), lambda n, s: (n, 0, s)),  # logscale
            ],
        ),
        compiler_params=pltpu.CompilerParams(
            dimension_semantics=("parallel", "parallel")),
    )(x, w_fused, b_fused)

    # Free reshapes back to NCHW (contiguous split of the last axis).
    return loc3.reshape(N, C_out, H, W), ls3.reshape(N, C_out, H, W)


def make_params(key, c_in, c_out, std_init=0.5):
    """Deterministic parameter init mirroring DGaussNet.__init__.

    x_loc: default Conv2d init (uniform(-1/sqrt(fan_in), +1/sqrt(fan_in))).
    x_logscale (std_init > 0): weight = 0, bias = log(std_init).
    Weights are stored in the PyTorch conv layout (C_out, C_in); biases (C_out, 1).
    """
    k1, k2 = jax.random.split(key)
    bound = 1.0 / math.sqrt(float(c_in))  # kernel_size = 1 -> fan_in = c_in
    w_loc = jax.random.uniform(k1, (c_out, c_in), jnp.float32, -bound, bound)
    b_loc = jax.random.uniform(k2, (c_out, 1), jnp.float32, -bound, bound)
    w_ls = jnp.zeros((c_out, c_in), jnp.float32)
    b_ls = jnp.full((c_out, 1), math.log(std_init), jnp.float32)
    # TODO(synk): requires_grad flags (fixed/shared/diag covariance) are a
    # training-time concern with no forward-pass / Pallas equivalent.
    return w_loc, b_loc, w_ls, b_ls


if __name__ == "__main__":
    # args.widths[0] = 32 (C_in), args.input_channels = 4 (C_out)
    N, C_in, C_out, H, W = 2, 32, 4, 16, 16
    key = jax.random.PRNGKey(0)
    kh, kp = jax.random.split(key)

    h = jax.random.normal(kh, (N, C_in, H, W), jnp.float32)
    w_loc, b_loc, w_ls, b_ls = make_params(kp, C_in, C_out, std_init=0.5)

    t = 0.7  # temperature argument of forward(h, t); use None -> log_t = 0.0
    log_t = jnp.array([[math.log(t)]], jnp.float32)

    loc, logscale = dgauss_forward(h, w_loc, b_loc, w_ls, b_ls, log_t)
    jax.block_until_ready((loc, logscale))

    # Pure-JAX reference (1x1 conv == channel matmul on NCHW).
    ref_loc = jnp.einsum("oi,nihw->nohw", w_loc, h) + b_loc.reshape(1, C_out, 1, 1)
    ref_ls = (jnp.einsum("oi,nihw->nohw", w_ls, h)
              + b_ls.reshape(1, C_out, 1, 1) + math.log(t))

    assert loc.shape == (N, C_out, H, W) and logscale.shape == (N, C_out, H, W)
    assert jnp.allclose(loc, ref_loc, atol=1e-5, rtol=1e-5)
    assert jnp.allclose(logscale, ref_ls, atol=1e-5, rtol=1e-5)

    print("KERNEL_OK")
</pallas_src>

<mosaic_0001>
module attributes {stable_mosaic.version = 11 : i64} {
  func.func @_dgauss_kernel(%arg0: i32, %arg1: i32, %arg2: memref<1x32x128xf32, #tpu.memory_space<vmem>>, %arg3: memref<8x32xf32, #tpu.memory_space<vmem>>, %arg4: memref<8x1xf32, #tpu.memory_space<vmem>>, %arg5: memref<1x4x128xf32, #tpu.memory_space<vmem>>, %arg6: memref<1x4x128xf32, #tpu.memory_space<vmem>>) attributes {dimension_semantics = [#tpu.dimension_semantics<parallel>, #tpu.dimension_semantics<parallel>], iteration_bounds = array<i64: 2, 2>, scalar_prefetch = 0 : i64, scratch_operands = 0 : i64, tpu.core_type = #tpu.core_type<tc>, window_params = [{transform_indices = @transform_0, window_bounds = array<i64: 1, 32, 128>}, {pipeline_mode = #tpu.pipeline_mode<synchronous>, transform_indices = @transform_1, window_bounds = array<i64: 8, 32>}, {pipeline_mode = #tpu.pipeline_mode<synchronous>, transform_indices = @transform_2, window_bounds = array<i64: 8, 1>}, {transform_indices = @transform_3, window_bounds = array<i64: 1, 4, 128>}, {transform_indices = @transform_4, window_bounds = array<i64: 1, 4, 128>}]} {
    %c0 = arith.constant 0 : index
    %c0_0 = arith.constant 0 : index
    %c0_1 = arith.constant 0 : index
    %0 = vector.load %arg2[%c0, %c0_0, %c0_1] : memref<1x32x128xf32, #tpu.memory_space<vmem>>, vector<1x32x128xf32>
    %1 = vector.shape_cast %0 : vector<1x32x128xf32> to vector<32x128xf32>
    %c0_2 = arith.constant 0 : index
    %c0_3 = arith.constant 0 : index
    %2 = vector.load %arg3[%c0_2, %c0_3] : memref<8x32xf32, #tpu.memory_space<vmem>>, vector<8x32xf32>
    %cst = arith.constant dense<0.000000e+00> : vector<8x128xf32>
    %3 = tpu.matmul %2, %1, %cst {dimension_numbers = #tpu.dot_dimension_numbers<[1], [0], [0], [1], [0, 0, 1, 1], [], []>} : vector<8x32xf32>, vector<32x128xf32>, vector<8x128xf32> -> vector<8x128xf32>
    %c0_4 = arith.constant 0 : index
    %c0_5 = arith.constant 0 : index
    %4 = vector.load %arg4[%c0_4, %c0_5] : memref<8x1xf32, #tpu.memory_space<vmem>>, vector<8x1xf32>
    %5 = vector.broadcast %4 : vector<8x1xf32> to vector<8x128xf32>
    %6 = arith.addf %3, %5 : vector<8x128xf32>
    %7 = vector.extract_strided_slice %6 {offsets = [0, 0], sizes = [4, 128], strides = [1, 1]} : vector<8x128xf32> to vector<4x128xf32>
    %c0_6 = arith.constant 0 : index
    %c0_7 = arith.constant 0 : index
    %c0_8 = arith.constant 0 : index
    %8 = vector.load %arg5[%c0_6, %c0_7, %c0_8] : memref<1x4x128xf32, #tpu.memory_space<vmem>>, vector<1x4x128xf32>
    %9 = vector.shape_cast %8 : vector<1x4x128xf32> to vector<4x128xf32>
    %10 = vector.shape_cast %7 : vector<4x128xf32> to vector<1x4x128xf32>
    tpu.vector_store %arg5[%c0_6, %c0_7, %c0_8], %10 {strides = array<i32>} : memref<1x4x128xf32, #tpu.memory_space<vmem>>, vector<1x4x128xf32>,
    %11 = vector.extract_strided_slice %6 {offsets = [4, 0], sizes = [4, 128], strides = [1, 1]} : vector<8x128xf32> to vector<4x128xf32>
    %c0_9 = arith.constant 0 : index
    %c0_10 = arith.constant 0 : index
    %c0_11 = arith.constant 0 : index
    %12 = vector.load %arg6[%c0_9, %c0_10, %c0_11] : memref<1x4x128xf32, #tpu.memory_space<vmem>>, vector<1x4x128xf32>
    %13 = vector.shape_cast %12 : vector<1x4x128xf32> to vector<4x128xf32>
    %14 = vector.shape_cast %11 : vector<4x128xf32> to vector<1x4x128xf32>
    tpu.vector_store %arg6[%c0_9, %c0_10, %c0_11], %14 {strides = array<i32>} : memref<1x4x128xf32, #tpu.memory_space<vmem>>, vector<1x4x128xf32>,
    return
  }
  func.func @transform_0(%arg0: i32, %arg1: i32) -> (i32, i32, i32) {
    %c0_i32 = arith.constant 0 : i32
    %c0_i32_0 = arith.constant 0 : i32
    return %arg0, %c0_i32, %arg1 : i32, i32, i32
  }
  func.func @transform_1(%arg0: i32, %arg1: i32) -> (i32, i32) {
    %c0_i32 = arith.constant 0 : i32
    %c0_i32_0 = arith.constant 0 : i32
    %c0_i32_1 = arith.constant 0 : i32
    return %c0_i32, %c0_i32_0 : i32, i32
  }
  func.func @transform_2(%arg0: i32, %arg1: i32) -> (i32, i32) {
    %c0_i32 = arith.constant 0 : i32
    %c0_i32_0 = arith.constant 0 : i32
    %c0_i32_1 = arith.constant 0 : i32
    return %c0_i32, %c0_i32_0 : i32, i32
  }
  func.func @transform_3(%arg0: i32, %arg1: i32) -> (i32, i32, i32) {
    %c0_i32 = arith.constant 0 : i32
    %c0_i32_0 = arith.constant 0 : i32
    return %arg0, %c0_i32, %arg1 : i32, i32, i32
  }
  func.func @transform_4(%arg0: i32, %arg1: i32) -> (i32, i32, i32) {
    %c0_i32 = arith.constant 0 : i32
    %c0_i32_0 = arith.constant 0 : i32
    return %arg0, %c0_i32, %arg1 : i32, i32, i32
  }
}

</mosaic_0001>

<bundles_post_ra>
// kernel: dgauss_forward.1
= control target key start
LH: loop header
LB: loop body
LE: loop exit
PB: predicated region body
PF: predicated region fallthrough
CT: control target
= control target key end

     0   :  { %s695_s15 = smov 0   ;;  %s697_s16 = smov 0   ;;  %s795_s0 = inlined_call_operand.vmem [shape: f32[2,32,256], index: 0, kind: input, shape index: {}]   ;;  %s796_s1 = inlined_call_operand.vmem [shape: f32[8,32], index: 1, kind: input, shape index: {}]   ;;  %s797_s2 = inlined_call_operand.vmem [shape: f32[8,1], index: 2, kind: input, shape index: {}]   ;;  %s798_s3 = inlined_call_operand.vmem [shape: f32[2,4,256], index: 3, kind: output, shape index: {0}]   ;;  %s799_s4 = inlined_call_operand.vmem [shape: f32[2,4,256], index: 4, kind: output, shape index: {1}]  }
   0x1   :  { %s699_s17 = smov 0   ;;  %s701_s18 = smov 0  }
   0x2   :  { %s703_s19 = smov 0   ;;  %s705_s20 = smov 0  }
   0x3   :  { %s707_s21 = smov 0  }
   0x4 LB: > { %s24_s22 = sadd.s32 1, %s656_s19  ;;  %s27_s23 = sadd.s32 1, %s660_s20  ;;  %s664_s21 = sphi %s707_s21, %s15_s21   ;;  %s660_s20 = sphi %s705_s20, %s805_s20   ;;  %s656_s19 = sphi %s703_s19, %s804_s19   ;;  %s652_s18 = sphi %s701_s18, %s803_s18   ;;  %s648_s17 = sphi %s699_s17, %s802_s17   ;;  %s644_s16 = sphi %s697_s16, %s801_s16   ;;  %s640_s15 = sphi %s695_s15, %s800_s15  }
   0x5   : > { %p25_p0 = scmp.ge.s32.totalorder %s24_s22, 2  ;;  %p43_p1 = scmp.ne.s32.totalorder %s644_s16, %s640_s15 }
   0x6   : > { %p44_p2 = scmp.eq.s32.totalorder %s664_s21, 0  ;;  %s36_s27 = sadd.s32 1, %s644_s16 }
   0x7   : > { %s807_s22 = smov (%p25_p0, %s24_s22), 0  ;;  %s809_s23 = smov (!%p25_p0, %s27_s23), %s660_s20 }
   0x8   : > { %p45_p3 = por %p44_p2, %p43_p1  ;;  %p29_p4 = scmp.ge.s32.totalorder %s809_s23, 2 }
   0x9   : > { %s32_s24 = ssub.s32 %s656_s19, %s807_s22  ;;  %p514_p6 = scmp.ge.s32.totalorder %s664_s21, 4 }
   0xa   : > { %s811_s23 = smov (%p29_p4, %s809_s23), 0 }
   0xb   : > { %s31_s25 = ssub.s32 %s660_s20, %s811_s23  ;;  %173 = sbr.rel (%p514_p6) target bundleno = 26 (0x1a), region = 24 }
   0xc   : > { %s33_s26 = sor.u32 %s32_s24, %s31_s25 }
   0xd   : > { %p34_p5 = scmp.eq.s32.totalorder %s33_s26, 0 }
   0xf   : > { %s746_s28 = scalar_select %p34_p5, %s644_s16, %s36_s27  }
  0x12   : > { %176 = sbr.rel (!%p45_p3) target bundleno = 26 (0x1a), region = 28  ;;  %s178_s29 = sand.u32 (%p45_p3), 1, %s644_s16  }
  0x13   : > { %s516_s30 = sshll.u32 (%p45_p3), %s660_s20, 3  ;;  %s515_s5 = sshll.u32 (%p45_p3), %s178_s29, 5 }
  0x14   : > { %s182_s6 = sadd.s32 (%p45_p3), %s656_s19, %s516_s30  ;;  %s180_s11 = scalar_lea.vmem (%p45_p3), [#allocation2], %s515_s5 }
  0x15   : > { %s517_s7 = sshll.u32 (%p45_p3), %s182_s6, 3 }
  0x16   : > { %s184_s10 = scalar_lea.vmem (%p45_p3), %s795_s0, %s517_s7 }
  0x17   : > { %v218_v0 = vld [vmem:[%s184_s10] sm:$0xff] (%p45_p3)  ;;  %v220_v1 = vld [vmem:[%s184_s10 + $0x10] sm:$0xff] (%p45_p3) }
  0x18   : > { %v222_v2 = vld [vmem:[%s184_s10 + $0x20] sm:$0xff] (%p45_p3)  ;;  %219 = vst [vmem:[%s180_s11] sm:$0xff] (%p45_p3), %v218_v0  ;;  %221 = vst [vmem:[%s180_s11 + $0x8] sm:$0xff] (%p45_p3), %v220_v1  ;;  %v224_v3 = vld [vmem:[%s184_s10 + $0x30] sm:$0xff] (%p45_p3) }
  0x19   : > { %223 = vst [vmem:[%s180_s11 + $0x10] sm:$0xff] %v222_v2  ;;  %225 = vst [vmem:[%s180_s11 + $0x18] sm:$0xff] %v224_v3 }
  0x1a PF: > { %p518_p7 = scmp.ge.s32.totalorder %s664_s21, 1  ;;  %p230_p8 = scmp.lt.s32.totalorder %s664_s21, 5 }
  0x1c   : > { %p231_p9 = pnand %p518_p7, %p230_p8 }
  0x1d   : > { %s237_s12 = sand.u32 (!%p231_p9), 1, %s640_s15   ;;  %v666_v4 = vmov (!%p231_p9), 0.0|0.0   ;;  %vm667_vm0 = vmmov (!%p231_p9), 0   ;;  %v668_v5 = vmov (!%p231_p9), 0.0   ;;  %v294_v6 = vld [vmem:[%s797_s2] sm:$0xff] (!%p231_p9)  ;;  %v669_v7 = vmov (!%p231_p9), 0  }
  0x1e   : > { %234 = sbr.rel (%p231_p9) target bundleno = 257 (0x101), region = 66  ;;  %543 = vmatprep.subr.bf16.mxu0 (!%p231_p9), %v666_v4  ;;  %s519_s13 = sshll.u32 (!%p231_p9), %s237_s12, 5  ;;  %540 = vmatprep.mubr.msk.f32.mxu0 (!%p231_p9), %vm667_vm0, %v668_v5  ;;  %v293_v14 = vld [vmem:[%s796_s1] sm:$0xff] (!%p231_p9)  ;;  %vm300_vm1 = vcmask (!%p231_p9), 261120  }
  0x1f   : > { %609 = vset.pattern.permute.xlu0 (!%p231_p9), %v669_v7  ;;  %s239_s25 = scalar_lea.vmem (!%p231_p9), [#allocation2], %s519_s13  ;;  %p273_p10 = scmp.lt.s32.totalorder (!%p231_p9), %s652_s18, 1 }
  0x20   : > { %v289_v8 = vld [vmem:[%s239_s25] sm:$0xff] (!%p231_p9)  ;;  %v290_v9 = vld [vmem:[%s239_s25 + $0x8] sm:$0xff] (!%p231_p9)  ;;  %v291_v10 = vld [vmem:[%s239_s25 + $0x10] sm:$0xff] (!%p231_p9)  ;;  %297 = vperm.xlu0 (!%p231_p9), %609, %v294_v6   ;;  %p275_p11 = scmp.lt.s32.totalorder (!%p231_p9), %s648_s17, 1 }
  0x21   : > { %v544_v11 = vpack.c.bf16 (!%p231_p9), %v290_v9, %v289_v8  ;;  %v292_v12 = vld [vmem:[%s239_s25 + $0x18] sm:$0xff] (!%p231_p9) }
  0x22   : > { %v547_v13 = vpack.c.bf16 (!%p231_p9), %v292_v12, %v291_v10 }
  0x23   : > { %545 = vmatpush3.bf16.msra.mxu0 (!%p231_p9), %v544_v11 }
  0x24   : > { %546 = vmatprep.subr.bf16.mxu0 (!%p231_p9), %v666_v4 }
  0x25   : > { %s813_s18 = smov (!%p273_p10, %s652_s18), 1  ;;  %s815_s17 = smov (!%p275_p11, %s648_s17), 1 }
  0x26   : > { %s520_s27 = sshll.u32 %s813_s18, 1 }
  0x27   : > { %548 = vmatpush3.bf16.msra.mxu0 %v547_v13  ;;  %s278_s29 = sadd.s32 %s520_s27, %s815_s17 }
  0x28   : > { %s521_s30 = sshll.u32 %s278_s29, 2 }
  0x29   : > { %s280_s7 = scalar_lea.vmem %s798_s3, %s521_s30  ;;  %s288_s10 = scalar_lea.vmem %s799_s4, %s521_s30 }
  0x2a   : > { %541 = vmatmul.mubr.msk.f32.vlgmr.msra.gmra.mrb[0].mxu0 %vm300_vm1, %v293_v14 }
  0x9f   : > { %v298_v15 = vpop.permute.xlu0 %297 }
  0xfd   : > { %v370_v16 = vpop.f32.mrb[0].mxu0 }
  0xfe   : > { %v371_v17 = vadd.f32 %v370_v16, %v298_v15  ;;  %v542_v18 = vpop.f32.mrb[1].mxu0 }
 0x100   : > { %374 = vst [vmem:[%s280_s7] sm:$0xf] %v371_v17  ;;  %375 = vst [vmem:[%s288_s10 - $0x4] sm:$0xf0] %v371_v17 }
 0x101 PF: > { %s15_s21 = sadd.s32 1, %s664_s21   ;;  %s800_s15 = smov %s644_s16 }
 0x102   : > { %p12_p12 = scmp.ge.s32.totalorder %s15_s21, 6   ;;  %s801_s16 = smov %s746_s28 }
 0x103   : > { %s802_s17 = smov %s656_s19  ;;  %s803_s18 = smov %s660_s20 }
 0x104   : > { %s804_s19 = smov %s807_s22  ;;  %s805_s20 = smov %s811_s23 }
 0x105   :  { %14 = sbr.rel (!%p12_p12) target bundleno = 4 (0x4), region = 117 }

</bundles_post_ra>
